<compile_context>
chip_gen: v5e
topology: v5e:2x2
jax: 0.10.0
libtpu: 0.0.40
codegen_flags: <defaults>
</compile_context>

<pallas_src>
import functools

import numpy as np
import jax
import jax.numpy as jnp
from jax.experimental import pallas as pl
from jax.experimental.pallas import tpu as pltpu

NEG_FILL = -65504.0  # == -torch.finfo(torch.float16).max


# ------------------------- flash-attention kernel ---------------------------
def _flash_body(q_ref, k_ref, v_ref, mask_ref, o_ref, m_sc, l_sc, acc_sc, *,
                scale):
    """Online-softmax attention body; mask_ref is None for the unmasked path."""
    kv = pl.program_id(2)

    @pl.when(kv == 0)
    def _init():
        m_sc[...] = jnp.full_like(m_sc, -jnp.inf)
        l_sc[...] = jnp.zeros_like(l_sc)
        acc_sc[...] = jnp.zeros_like(acc_sc)

    # Fold 1/sqrt(d_k) into q: scales tq*dk elements instead of tq*tk logits.
    q = q_ref[0] * scale                         # (tq, dk), stays in input dtype
    k = k_ref[0]                                 # (tk, dk)
    v = v_ref[0]                                 # (tk, dv)

    # "qd,kd->qk": contract last axes -> k transpose folded into MXU operand.
    s = jax.lax.dot_general(q, k, (((1,), (1,)), ((), ())),
                            preferred_element_type=jnp.float32)  # (tq, tk) f32

    if mask_ref is not None:
        # torch: masked_fill_(mask, -finfo(f16).max) on the scaled logits.
        s = jnp.where(mask_ref[0] != 0, jnp.float32(NEG_FILL), s)

    m_prev = m_sc[...]
    m_new = jnp.maximum(m_prev, jnp.max(s, axis=-1, keepdims=True))
    alpha = jnp.exp(m_prev - m_new)
    p = jnp.exp(s - m_new)
    l_sc[...] = alpha * l_sc[...] + jnp.sum(p, axis=-1, keepdims=True)
    # Cast weights to v.dtype so bf16 inputs keep the PV matmul on the bf16 MXU.
    acc_sc[...] = alpha * acc_sc[...] + jnp.dot(
        p.astype(v.dtype), v, preferred_element_type=jnp.float32)
    m_sc[...] = m_new

    @pl.when(kv == pl.num_programs(2) - 1)
    def _finalize():
        o_ref[0] = (acc_sc[...] *
                    pl.reciprocal(l_sc[...], approx=False)).astype(o_ref.dtype)


def _flash_kernel(q_ref, k_ref, v_ref, o_ref, m_sc, l_sc, acc_sc, *, scale):
    _flash_body(q_ref, k_ref, v_ref, None, o_ref, m_sc, l_sc, acc_sc,
                scale=scale)


def _flash_masked_kernel(q_ref, k_ref, v_ref, mask_ref, o_ref,
                         m_sc, l_sc, acc_sc, *, scale):
    _flash_body(q_ref, k_ref, v_ref, mask_ref, o_ref, m_sc, l_sc, acc_sc,
                scale=scale)


# -------------------------------- wrapper -----------------------------------
def _choose_tile(length, target, multiple):
    """Largest tile <= target that divides `length` and is a multiple of
    `multiple`; falls back to the full axis (always a legal block shape)."""
    if length <= target:
        return length
    t = (target // multiple) * multiple
    while t >= multiple:
        if length % t == 0:
            return t
        t -= multiple
    return length


def scaled_dot_product_attention(q, k, v, mask=None, *, d_k=None,
                                 tq_target=256, tk_target=512):
    """JAX/Pallas equivalent of ScaledDotProductAttentionFromZenn.forward."""
    B, Lq, dk = q.shape
    Bk, Lk, dkk = k.shape
    Bv, Lv, dv = v.shape
    assert Bk == B and Bv == B and Lv == Lk and dkk == dk
    if d_k is None:
        d_k = dk
    scale = float(1.0 / np.sqrt(d_k))

    tq = _choose_tile(Lq, tq_target, 8)      # sublane-granular q tile
    tk = _choose_tile(Lk, tk_target, 128)    # lane-granular k/v/mask tile
    grid = (B, Lq // tq, Lk // tk)

    # NOTE: best store-path perf when dv is a multiple of 128 (lane-dense out).
    q_spec = pl.BlockSpec((1, tq, dk), lambda b, qi, ki: (b, qi, 0))
    k_spec = pl.BlockSpec((1, tk, dk), lambda b, qi, ki: (b, ki, 0))
    v_spec = pl.BlockSpec((1, tk, dv), lambda b, qi, ki: (b, ki, 0))
    o_spec = pl.BlockSpec((1, tq, dv), lambda b, qi, ki: (b, qi, 0))
    out_shape = jax.ShapeDtypeStruct((B, Lq, dv), q.dtype)

    scratch = [pltpu.VMEM((tq, 1), jnp.float32),   # running max
               pltpu.VMEM((tq, 1), jnp.float32),   # running sum
               pltpu.VMEM((tq, dv), jnp.float32)]  # output accumulator

    masked = mask is not None
    itemsize = jnp.dtype(q.dtype).itemsize
    tile_bytes = (tq * dk + tk * dk + tk * dv + tq * dv) * itemsize
    if masked:
        tile_bytes += tq * tk                      # int8 mask tile
    scratch_bytes = (2 * tq + tq * dv) * 4
    # double-buffered tiles + scratch, generous margin; clamp to [32, 64] MiB
    vmem_limit = int(min(max(4 * (2 * tile_bytes) + scratch_bytes, 32 * 2**20),
                         64 * 2**20))

    flops = 2 * B * Lq * Lk * dk + 2 * B * Lq * Lk * dv
    bytes_accessed = itemsize * (q.size + k.size + v.size + B * Lq * dv)
    if masked:
        bytes_accessed += B * Lq * Lk              # int8 mask
    cost = pl.CostEstimate(flops=flops, transcendentals=B * Lq * Lk,
                           bytes_accessed=int(bytes_accessed))

    cparams = pltpu.CompilerParams(
        dimension_semantics=("parallel", "parallel", "arbitrary"),
        vmem_limit_bytes=vmem_limit)

    if mask is None:
        return pl.pallas_call(
            functools.partial(_flash_kernel, scale=scale),
            out_shape=out_shape,
            grid=grid,
            in_specs=[q_spec, k_spec, v_spec],
            out_specs=o_spec,
            scratch_shapes=scratch,
            compiler_params=cparams,
            cost_estimate=cost,
        )(q, k, v)

    if mask.ndim != 3:
        raise ValueError(
            "mask.dim != attention_weight.dim, mask.dim={}, attention_weight.dim=3"
            .format(mask.ndim))
    # int8 mask: 4x less HBM traffic than int32 for the largest input tensor.
    mask_i8 = mask.astype(jnp.int8)
    m_spec = pl.BlockSpec((1, tq, tk), lambda b, qi, ki: (b, qi, ki))
    return pl.pallas_call(
        functools.partial(_flash_masked_kernel, scale=scale),
        out_shape=out_shape,
        grid=grid,
        in_specs=[q_spec, k_spec, v_spec, m_spec],
        out_specs=o_spec,
        scratch_shapes=scratch,
        compiler_params=cparams,
        cost_estimate=cost,
    )(q, k, v, mask_i8)


# --------------------------- pure-JAX reference ------------------------------
def sdpa_ref(q, k, v, mask=None, *, d_k=None):
    hp = jax.lax.Precision.HIGHEST
    if d_k is None:
        d_k = q.shape[-1]
    logit = jnp.einsum("bqd,bkd->bqk", q, k, precision=hp) / np.sqrt(d_k)
    if mask is not None:
        logit = jnp.where(mask, NEG_FILL, logit)
    w = jax.nn.softmax(logit, axis=2)
    return jnp.einsum("bqk,bkd->bqd", w, v, precision=hp)


# ---------------------------------- main -------------------------------------
if __name__ == "__main__":
    key = jax.random.PRNGKey(0)
    kq, kk, kv_, km, kq2, kk2, kv2, km2 = jax.random.split(key, 8)

    # --- small shapes consistent with the module: batch=2, seq=8, d_k=d_v=32 ---
    B, L, DK, DV = 2, 8, 32, 32
    q = jax.random.normal(kq, (B, L, DK), jnp.float32)
    k = jax.random.normal(kk, (B, L, DK), jnp.float32)
    v = jax.random.normal(kv_, (B, L, DV), jnp.float32)

    out = jax.block_until_ready(scaled_dot_product_attention(q, k, v, d_k=DK))
    assert out.shape == (B, L, DV) and out.dtype == jnp.float32
    ref = jax.block_until_ready(sdpa_ref(q, k, v, d_k=DK))
    assert jnp.allclose(out, ref, atol=1e-2, rtol=1e-2)

    mask = jax.random.bernoulli(km, 0.3, (B, L, L))
    out_m = jax.block_until_ready(
        scaled_dot_product_attention(q, k, v, mask=mask, d_k=DK))
    ref_m = jax.block_until_ready(sdpa_ref(q, k, v, mask=mask, d_k=DK))
    assert jnp.allclose(out_m, ref_m, atol=1e-2, rtol=1e-2)

    # --- larger shape exercising the flash tiling (grid=(2, 4, 2)): multiple
    #     kv tiles -> online softmax across the "arbitrary" reduction axis ---
    B2, L2, DK2, DV2 = 2, 1024, 64, 128
    q2 = jax.random.normal(kq2, (B2, L2, DK2), jnp.float32)
    k2 = jax.random.normal(kk2, (B2, L2, DK2), jnp.float32)
    v2 = jax.random.normal(kv2, (B2, L2, DV2), jnp.float32)
    mask2 = jax.random.bernoulli(km2, 0.25, (B2, L2, L2))
    out2 = jax.block_until_ready(
        scaled_dot_product_attention(q2, k2, v2, mask=mask2, d_k=DK2))
    ref2 = jax.block_until_ready(sdpa_ref(q2, k2, v2, mask=mask2, d_k=DK2))
    assert jnp.allclose(out2, ref2, atol=2e-2, rtol=2e-2)

    print("KERNEL_OK")
</pallas_src>

<mosaic_0001>
module attributes {stable_mosaic.version = 11 : i64} {
  func.func @_flash_kernel(%arg0: i32, %arg1: i32, %arg2: i32, %arg3: memref<1x8x32xf32, #tpu.memory_space<vmem>>, %arg4: memref<1x8x32xf32, #tpu.memory_space<vmem>>, %arg5: memref<1x8x32xf32, #tpu.memory_space<vmem>>, %arg6: memref<1x8x32xf32, #tpu.memory_space<vmem>>, %arg7: memref<8x1xf32, #tpu.memory_space<vmem>>, %arg8: memref<8x1xf32, #tpu.memory_space<vmem>>, %arg9: memref<8x32xf32, #tpu.memory_space<vmem>>) attributes {dimension_semantics = [#tpu.dimension_semantics<parallel>, #tpu.dimension_semantics<parallel>, #tpu.dimension_semantics<arbitrary>], iteration_bounds = array<i64: 2, 1, 1>, scalar_prefetch = 0 : i64, scratch_operands = 3 : i64, tpu.core_type = #tpu.core_type<tc>, window_params = [{transform_indices = @transform_0, window_bounds = array<i64: 1, 8, 32>}, {transform_indices = @transform_1, window_bounds = array<i64: 1, 8, 32>}, {transform_indices = @transform_2, window_bounds = array<i64: 1, 8, 32>}, {transform_indices = @transform_3, window_bounds = array<i64: 1, 8, 32>}]} {
    %c0_i32 = arith.constant 0 : i32
    %0 = arith.cmpi eq, %arg2, %c0_i32 : i32
    %1 = arith.extui %0 : i1 to i32
    %c0_i32_0 = arith.constant 0 : i32
    %2 = arith.cmpi ne, %1, %c0_i32_0 : i32
    scf.if %2 {
      %cst_27 = arith.constant 0xFF800000 : f32
      %37 = vector.broadcast %cst_27 : f32 to vector<8x1xf32>
      %c0_28 = arith.constant 0 : index
      %c0_29 = arith.constant 0 : index
      %38 = vector.load %arg7[%c0_28, %c0_29] : memref<8x1xf32, #tpu.memory_space<vmem>>, vector<8x1xf32>
      tpu.vector_store %arg7[%c0_28, %c0_29], %37 {strides = array<i32>} : memref<8x1xf32, #tpu.memory_space<vmem>>, vector<8x1xf32>,
      %cst_30 = arith.constant 0.000000e+00 : f32
      %39 = vector.broadcast %cst_30 : f32 to vector<8x1xf32>
      %c0_31 = arith.constant 0 : index
      %c0_32 = arith.constant 0 : index
      %40 = vector.load %arg8[%c0_31, %c0_32] : memref<8x1xf32, #tpu.memory_space<vmem>>, vector<8x1xf32>
      tpu.vector_store %arg8[%c0_31, %c0_32], %39 {strides = array<i32>} : memref<8x1xf32, #tpu.memory_space<vmem>>, vector<8x1xf32>,
      %cst_33 = arith.constant 0.000000e+00 : f32
      %41 = vector.broadcast %cst_33 : f32 to vector<8x32xf32>
      %c0_34 = arith.constant 0 : index
      %c0_35 = arith.constant 0 : index
      %42 = vector.load %arg9[%c0_34, %c0_35] : memref<8x32xf32, #tpu.memory_space<vmem>>, vector<8x32xf32>
      tpu.vector_store %arg9[%c0_34, %c0_35], %41 {strides = array<i32>} : memref<8x32xf32, #tpu.memory_space<vmem>>, vector<8x32xf32>,
    } else {
    }
    %c0 = arith.constant 0 : index
    %c0_1 = arith.constant 0 : index
    %c0_2 = arith.constant 0 : index
    %3 = vector.load %arg3[%c0, %c0_1, %c0_2] : memref<1x8x32xf32, #tpu.memory_space<vmem>>, vector<1x8x32xf32>
    %4 = vector.shape_cast %3 : vector<1x8x32xf32> to vector<8x32xf32>
    %cst = arith.constant 0.176776692 : f32
    %5 = vector.broadcast %cst : f32 to vector<8x32xf32>
    %6 = arith.mulf %4, %5 : vector<8x32xf32>
    %c0_3 = arith.constant 0 : index
    %c0_4 = arith.constant 0 : index
    %c0_5 = arith.constant 0 : index
    %7 = vector.load %arg4[%c0_3, %c0_4, %c0_5] : memref<1x8x32xf32, #tpu.memory_space<vmem>>, vector<1x8x32xf32>
    %8 = vector.shape_cast %7 : vector<1x8x32xf32> to vector<8x32xf32>
    %c0_6 = arith.constant 0 : index
    %c0_7 = arith.constant 0 : index
    %c0_8 = arith.constant 0 : index
    %9 = vector.load %arg5[%c0_6, %c0_7, %c0_8] : memref<1x8x32xf32, #tpu.memory_space<vmem>>, vector<1x8x32xf32>
    %10 = vector.shape_cast %9 : vector<1x8x32xf32> to vector<8x32xf32>
    %cst_9 = arith.constant dense<0.000000e+00> : vector<8x8xf32>
    %11 = tpu.matmul %6, %8, %cst_9 {dimension_numbers = #tpu.dot_dimension_numbers<[1], [1], [0], [0], [0, 0, 1, 0], [], []>} : vector<8x32xf32>, vector<8x32xf32>, vector<8x8xf32> -> vector<8x8xf32>
    %c0_10 = arith.constant 0 : index
    %c0_11 = arith.constant 0 : index
    %12 = vector.load %arg7[%c0_10, %c0_11] : memref<8x1xf32, #tpu.memory_space<vmem>>, vector<8x1xf32>
    %cst_12 = arith.constant dense<0xFF800000> : vector<8xf32>
    %13 = vector.multi_reduction <maximumf>, %11, %cst_12 [1] : vector<8x8xf32> to vector<8xf32>
    %14 = vector.shape_cast %13 : vector<8xf32> to vector<8x1xf32>
    %15 = arith.maximumf %12, %14 : vector<8x1xf32>
    %16 = arith.subf %12, %15 : vector<8x1xf32>
    %17 = math.exp %16 : vector<8x1xf32>
    %18 = vector.broadcast %15 : vector<8x1xf32> to vector<8x8xf32>
    %19 = arith.subf %11, %18 : vector<8x8xf32>
    %20 = math.exp %19 : vector<8x8xf32>
    %c0_13 = arith.constant 0 : index
    %c0_14 = arith.constant 0 : index
    %21 = vector.load %arg8[%c0_13, %c0_14] : memref<8x1xf32, #tpu.memory_space<vmem>>, vector<8x1xf32>
    %22 = arith.mulf %17, %21 : vector<8x1xf32>
    %cst_15 = arith.constant dense<0.000000e+00> : vector<8xf32>
    %23 = vector.multi_reduction <add>, %20, %cst_15 [1] : vector<8x8xf32> to vector<8xf32>
    %24 = vector.shape_cast %23 : vector<8xf32> to vector<8x1xf32>
    %25 = arith.addf %22, %24 : vector<8x1xf32>
    %c0_16 = arith.constant 0 : index
    %c0_17 = arith.constant 0 : index
    %26 = vector.load %arg8[%c0_16, %c0_17] : memref<8x1xf32, #tpu.memory_space<vmem>>, vector<8x1xf32>
    tpu.vector_store %arg8[%c0_16, %c0_17], %25 {strides = array<i32>} : memref<8x1xf32, #tpu.memory_space<vmem>>, vector<8x1xf32>,
    %c0_18 = arith.constant 0 : index
    %c0_19 = arith.constant 0 : index
    %27 = vector.load %arg9[%c0_18, %c0_19] : memref<8x32xf32, #tpu.memory_space<vmem>>, vector<8x32xf32>
    %28 = vector.broadcast %17 : vector<8x1xf32> to vector<8x32xf32>
    %29 = arith.mulf %28, %27 : vector<8x32xf32>
    %cst_20 = arith.constant dense<0.000000e+00> : vector<8x32xf32>
    %30 = tpu.matmul %20, %10, %cst_20 {dimension_numbers = #tpu.dot_dimension_numbers<[1], [0], [0], [1], [0, 0, 1, 1], [], []>} : vector<8x8xf32>, vector<8x32xf32>, vector<8x32xf32> -> vector<8x32xf32>
    %31 = arith.addf %29, %30 : vector<8x32xf32>
    %c0_21 = arith.constant 0 : index
    %c0_22 = arith.constant 0 : index
    %32 = vector.load %arg9[%c0_21, %c0_22] : memref<8x32xf32, #tpu.memory_space<vmem>>, vector<8x32xf32>
    tpu.vector_store %arg9[%c0_21, %c0_22], %31 {strides = array<i32>} : memref<8x32xf32, #tpu.memory_space<vmem>>, vector<8x32xf32>,
    %c0_23 = arith.constant 0 : index
    %c0_24 = arith.constant 0 : index
    %33 = vector.load %arg7[%c0_23, %c0_24] : memref<8x1xf32, #tpu.memory_space<vmem>>, vector<8x1xf32>
    tpu.vector_store %arg7[%c0_23, %c0_24], %15 {strides = array<i32>} : memref<8x1xf32, #tpu.memory_space<vmem>>, vector<8x1xf32>,
    %c0_i32_25 = arith.constant 0 : i32
    %34 = arith.cmpi eq, %arg2, %c0_i32_25 : i32
    %35 = arith.extui %34 : i1 to i32
    %c0_i32_26 = arith.constant 0 : i32
    %36 = arith.cmpi ne, %35, %c0_i32_26 : i32
    scf.if %36 {
      %c0_27 = arith.constant 0 : index
      %c0_28 = arith.constant 0 : index
      %37 = vector.load %arg9[%c0_27, %c0_28] : memref<8x32xf32, #tpu.memory_space<vmem>>, vector<8x32xf32>
      %c0_29 = arith.constant 0 : index
      %c0_30 = arith.constant 0 : index
      %38 = vector.load %arg8[%c0_29, %c0_30] : memref<8x1xf32, #tpu.memory_space<vmem>>, vector<8x1xf32>
      %39 = tpu.reciprocal %38 : vector<8x1xf32> -> vector<8x1xf32>
      %40 = vector.broadcast %39 : vector<8x1xf32> to vector<8x32xf32>
      %41 = arith.mulf %37, %40 : vector<8x32xf32>
      %c0_31 = arith.constant 0 : index
      %c0_32 = arith.constant 0 : index
      %c0_33 = arith.constant 0 : index
      %42 = vector.load %arg6[%c0_31, %c0_32, %c0_33] : memref<1x8x32xf32, #tpu.memory_space<vmem>>, vector<1x8x32xf32>
      %43 = vector.shape_cast %42 : vector<1x8x32xf32> to vector<8x32xf32>
      %44 = vector.shape_cast %41 : vector<8x32xf32> to vector<1x8x32xf32>
      tpu.vector_store %arg6[%c0_31, %c0_32, %c0_33], %44 {strides = array<i32>} : memref<1x8x32xf32, #tpu.memory_space<vmem>>, vector<1x8x32xf32>,
    } else {
    }
    return
  }
  func.func @transform_0(%arg0: i32, %arg1: i32, %arg2: i32) -> (i32, i32, i32) {
    %c0_i32 = arith.constant 0 : i32
    %c0_i32_0 = arith.constant 0 : i32
    return %arg0, %arg1, %c0_i32 : i32, i32, i32
  }
  func.func @transform_1(%arg0: i32, %arg1: i32, %arg2: i32) -> (i32, i32, i32) {
    %c0_i32 = arith.constant 0 : i32
    %c0_i32_0 = arith.constant 0 : i32
    return %arg0, %arg2, %c0_i32 : i32, i32, i32
  }
  func.func @transform_2(%arg0: i32, %arg1: i32, %arg2: i32) -> (i32, i32, i32) {
    %c0_i32 = arith.constant 0 : i32
    %c0_i32_0 = arith.constant 0 : i32
    return %arg0, %arg2, %c0_i32 : i32, i32, i32
  }
  func.func @transform_3(%arg0: i32, %arg1: i32, %arg2: i32) -> (i32, i32, i32) {
    %c0_i32 = arith.constant 0 : i32
    %c0_i32_0 = arith.constant 0 : i32
    return %arg0, %arg1, %c0_i32 : i32, i32, i32
  }
}

</mosaic_0001>

<bundles_post_ra>
// kernel: tpu_custom_call.1
= control target key start
LH: loop header
LB: loop body
LE: loop exit
PB: predicated region body
PF: predicated region fallthrough
CT: control target
= control target key end

     0   :  { %s1039_s0 = inlined_call_operand.hbm [shape: f32[2,8,32], index: 0, kind: input, shape index: {}]   ;;  %s1040_s1 = inlined_call_operand.hbm [shape: f32[2,8,32], index: 1, kind: input, shape index: {}]   ;;  %s1041_s2 = inlined_call_operand.hbm [shape: f32[2,8,32], index: 2, kind: input, shape index: {}]   ;;  %s1042_s3 = inlined_call_operand.hbm [shape: f32[2,8,32], index: 3, kind: output, shape index: {}]  }
   0x1   :  { %1045 = sst [smem:[#allocation18_spill]] %s1040_s1 }
   0x2   :  { %8 = vsyncpa [#allocation6], 0 }
   0x3   :  { %10 = vsyncpa [#allocation6 + $0x1], 0 }
   0x4   :  { %11 = vsyncpa [#allocation9], 0 }
   0x5   :  { %13 = vsyncpa [#allocation9 + $0x1], 0 }
   0x6   :  { %14 = vsyncpa [#allocation7], 0 }
   0x7   :  { %16 = vsyncpa [#allocation7 + $0x1], 0  ;;  %s869_s12 = smov 0   ;;  %s871_s13 = smov 0  }
   0x8   :  { %s873_s14 = smov 0   ;;  %s875_s15 = smov 0  }
   0x9   :  { %s877_s16 = smov 0   ;;  %s879_s17 = smov 0  }
   0xa LB: > { %1046 = sst [smem:[#allocation15_spill]] %s840_s16  ;;  %s900_s18 = sadd.s32 4294967295, %s844_s17   ;;  %s844_s17 = sphi %s879_s17, %s22_s17   ;;  %s840_s16 = sphi %s877_s16, %s1058_s16   ;;  %s836_s15 = sphi %s875_s15, %s1057_s15   ;;  %s832_s14 = sphi %s873_s14, %s1061_s14   ;;  %s828_s13 = sphi %s871_s13, %s1060_s13   ;;  %s824_s12 = sphi %s869_s12, %s1059_s12  }
   0xb   : > { %s563_s19 = sadd.s32 4294967294, %s844_s17   ;;  %s41_s20 = sadd.s32 1, %s840_s16 }
   0xc   : > { %s50_s21 = sadd.s32 1, %s832_s14  ;;  %p43_p0 = scmp.ge.s32.totalorder %s41_s20, 2 }
   0xd   : > { %p57_p1 = scmp.ne.s32.totalorder %s832_s14, %s828_s13  ;;  %p58_p2 = scmp.eq.s32.totalorder %s844_s17, 0 }
   0xe   : > { %p63_p3 = scmp.ne.s32.totalorder %s828_s13, %s824_s12  ;;  %s1063_s20 = smov (%p43_p0, %s41_s20), 0 }
   0xf   : > { %1047 = sst [smem:[#allocation16_spill]] %s1063_s20  ;;  %p912_p4 = por %p58_p2, %p57_p1 }
  0x10   : > { %p64_p5 = scmp.eq.s32.totalorder %s900_s18, 0  ;;  %s45_s23 = ssub.s32 %s840_s16, %s1063_s20 }
  0x11   : > { %p145_p6 = scmp.eq.s32.totalorder %s900_s18, 1  ;;  %p48_p7 = scmp.eq.s32.totalorder %s45_s23, 0 }
  0x12   : > { %p920_p8 = por %p64_p5, %p63_p3  ;;  %p151_p10 = scmp.eq.s32.totalorder %s563_s19, 1 }
  0x13   : > { %p924_p9 = por %p145_p6, %p57_p1  ;;  %p565_p12 = scmp.ge.s32.totalorder %s844_s17, 2 }
  0x14   : > { %s929_s26 = scalar_select %p48_p7, %s832_s14, %s50_s21  }
  0x15   : > { %p931_p11 = por %p151_p10, %p63_p3  ;;  %p606_p13 = scmp.lt.s32.totalorder %s844_s17, 2 }
  0x16   : > { %1051 = sst [smem:[#allocation17_spill]] %s929_s26  ;;  %s171_s28 = sand.u32 1, %s832_s14  }
  0x17   : > { %s566_s29 = sshll.u32 %s171_s28, 3  ;;  %s567_s30 = sshll.u32 %s840_s16, 3 }
  0x18   : > { %p941_p0 = pnand %p606_p13, %p912_p4  ;;  %s191_s5 = sand.u32 1, %s844_s17  }
  0x19   : > { %s1054_s1 = sld [smem:[#allocation18_spill]]  ;;  %s195_s10 = scalar_lea.vmem [#allocation8], %s566_s29 }
  0x1a   : > { %s204_s11 = sshll.u32 %s195_s10, 4  ;;  %s192_s19 = scalar_lea.sflag [#allocation9], %s191_s5  ;;  %s205_s11 = int_to_ptr.vmem [resolvable:$true] %s204_s11 }
  0x1b   : > { %p572_p1 = scmp.ge.s32.totalorder %s844_s17, 1  ;;  %p229_p2 = scmp.lt.s32.totalorder %s844_s17, 3 }
  0x1c   : > { %s180_s6 = scalar_lea.hbm %s1039_s0, %s567_s30  ;;  %s172_s10 = scalar_lea.sflag [#allocation6], %s171_s28 }
  0x1d   : > { %p953_p3 = pnand %p572_p1, %p229_p2  ;;  %s182_s7 = sshll.u32 %s180_s6, 4  ;;  %s183_s7 = int_to_ptr.hbm [resolvable:$true] %s182_s7 }
  0x1e   : > { %s215_s16 = scalar_lea.vmem [#allocation10], %s566_s29  ;;  %s970_s22 = sand.u32 (!%p953_p3), 1, %s828_s13  }
  0x1f   : > { %s200_s8 = scalar_lea.hbm %s1054_s1, %s567_s30  ;;  %s224_s26 = sshll.u32 %s215_s16, 4  ;;  %s225_s26 = int_to_ptr.vmem [resolvable:$true] %s224_s26 }
  0x20   : > { %s202_s9 = sshll.u32 %s200_s8, 4  ;;  %s175_s8 = scalar_lea.vmem [#allocation5], %s566_s29  ;;  %s203_s9 = int_to_ptr.hbm [resolvable:$true] %s202_s9 }
  0x21   : > { %598 = dma.hbm_to_vmem [thread:$0]  (!%p941_p0), %s203_s9, 128, %s205_s11, %s192_s19  }
  0x22   : > { %s184_s1 = sshll.u32 %s175_s8, 4  ;;  %s220_s11 = scalar_lea.hbm %s1041_s2, %s567_s30  ;;  %s185_s1 = int_to_ptr.vmem [resolvable:$true] %s184_s1 }
  0x23   : > { %595 = dma.hbm_to_vmem [thread:$0]  (!%p941_p0), %s183_s7, 128, %s185_s1, %s172_s10  }
  0x24   : > { %s222_s20 = sshll.u32 %s220_s11, 4  ;;  %233 = sbr.rel (%p953_p3) target bundleno = 660 (0x294), region = 32  ;;  %s223_s20 = int_to_ptr.hbm [resolvable:$true] %s222_s20 }
  0x25   : > { %601 = dma.hbm_to_vmem [thread:$0]  (!%p941_p0), %s223_s20, 128, %s225_s26, %s192_s19  }
  0x26   : > { %s973_s1 = sshll.u32 (!%p953_p3), %s970_s22, 3  ;;  %s236_s28 = scalar_lea.sflag (!%p953_p3), [#allocation6], %s970_s22 }
  0x27   : > { %s239_s30 = scalar_lea.vmem (!%p953_p3), [#allocation5], %s973_s1 }
  0x29   : > { %811 = dma.done.wait (%p920_p8), %s236_s28, 128  }
  0x2a   : > { %813 = vsyncadd (%p920_p8), %s236_s28, 4294967168  ;;  %s245_s16 = sand.u32 1, %s900_s18   ;;  %s249_s26 = scalar_lea.vmem [#allocation8], %s973_s1 }
  0x2b   : > { %s246_s20 = scalar_lea.sflag [#allocation9], %s245_s16 }
  0x2c   : > { %815 = dma.done.wait (%p920_p8), %s246_s20, 256  }
  0x2d   : > { %817 = vsyncadd (%p920_p8), %s246_s20, 4294967040  ;;  %vm300_vm0 = vcmask 261120   ;;  %v846_v0 = vmov 0.0   ;;  %v304_v1 = vld [vmem:[%s249_s26] sm:$0xff]  ;;  %v302_v2 = vld [vmem:[%s239_s30] sm:$0xff]  ;;  %vm297_vm1 = vcmask 7168  }
  0x2e   : > { %301 = vst.msk [vmem:[#allocation4] sm:$0xff] %vm300_vm0, %v846_v0  ;;  %577 = vmatpush.xpose.msk.msra.mxu0 %vm300_vm0, %v304_v1  ;;  %v303_v3 = vmul.f32 0.17677669, %v302_v2  ;;  %v847_v4 = vmov -inf   ;;  %vm334_vm2 = vcmask 64512   ;;  %v848_v7 = vmov 0  }
  0x2f   : > { %298 = vst.msk [vmem:[#allocation2] sm:$0xff] %vm297_vm1, %v847_v4  ;;  %659 = vset.pattern.permute.xlu0 %v848_v7  ;;  %660 = vset.pattern.permute.xlu1 %v848_v7  ;;  %s259_s18 = scalar_lea.vmem [#allocation10], %s973_s1  ;;  %s581_s24 = sshll.u32 %s836_s15, 3 }
  0x30   : > { %299 = vst.msk [vmem:[#allocation3] sm:$0xff] %vm297_vm1, %v846_v0  ;;  %661 = vset.pattern.permute.xlu2 %v848_v7  ;;  %v305_v12 = vld [vmem:[%s259_s18] sm:$0xff]  ;;  %s429_s19 = scalar_lea.hbm %s1042_s3, %s581_s24  ;;  %s292_s21 = scalar_lea.vmem [#allocation11], %s973_s1 }
  0x31   : > { %578 = vmatmul.msk.f32.vlgmr.msra.gmra.mxu0 %vm300_vm0, %v303_v3  ;;  %383 = vmatpush.msra.mxu1 %v305_v12  ;;  %s431_s23 = sshll.u32 %s292_s21, 4  ;;  %s433_s6 = sshll.u32 %s429_s19, 4  ;;  %s432_s23 = int_to_ptr.vmem [resolvable:$true] %s431_s23  ;;  %s434_s6 = int_to_ptr.hbm [resolvable:$true] %s433_s6 }
  0x32   : > { %s418_s7 = scalar_lea.sflag [#allocation7], %s970_s22  ;;  %s772_s8 = sshra.s32 %s434_s6, 4  ;;  %s773_s8 = int_to_ptr.hbm [resolvable:$true] %s772_s8 }
  0x33   : > { %s774_s10 = scalar_lea.hbm %s773_s8, 8  ;;  %s778_s9 = scalar_lea.hbm %s1042_s3, 16 }
  0x34   : > { %p775_p4 = scmp.ne.s32.totalorder %s773_s8, %s774_s10  ;;  %p779_p7 = scmp.lt.s32.totalorder %s773_s8, %s1042_s3 }
  0x35   : > { %v358_v29 = vld [vmem:[#allocation4] sm:$0xff]  ;;  %p780_p8 = scmp.lt.s32.totalorder %s778_s9, %s774_s10 }
  0x36   : > { %v333_v8 = vld [vmem:[#allocation2] sm:$0xff]  ;;  %p776_p5 = pnand %p775_p4, %p924_p9 }
  0x37   : > { %v350_v20 = vld [vmem:[#allocation3] sm:$0xff]  ;;  %p781_p10 = por %p780_p8, %p779_p7 }
  0x38   : > { %p777_p6 = pneg %p776_p5 }
  0x3a   : > { %p782_p13 = pnand %p781_p10, %p777_p6 }
  0xae   : > { %v330_v5 = vpop.f32.mrf.mxu0 }
  0xaf   : > { %v335_v6 = vsel %vm334_vm2, %v330_v5, -inf }
  0xb0   : > { %336 = vmax.xlane.f32.xlu0 %v335_v6 }
 0x123   : > { %v337_v9 = vpop.xlane.xlu0 %336 }
 0x124   : > { %v338_v10 = vmax.f32 %v333_v8, %v337_v9 }
 0x126   : > { %v339_v11 = vsub.f32 %v333_v8, %v338_v10  ;;  %390 = vst.msk [vmem:[#allocation2] sm:$0xff] %vm297_vm1, %v338_v10  ;;  %344 = vperm.xlu0 %659, %v338_v10  }
 0x128   : > { %v340_v18 = vmul.f32 1.442695, %v339_v11 }
 0x198   : > { %v345_v13 = vpop.permute.xlu0 %344 }
 0x199   : > { %v347_v14 = vsub.f32 %v330_v5, %v345_v13 }
 0x19b   : > { %v348_v15 = vmul.f32 1.442695, %v347_v14 }
 0x19d   : > { %662 = vpow2.f32 %v348_v15 }
 0x19e   : > { %664 = vpow2.f32 %v340_v18 }
 0x1a3   : > { %v663_v16 = vpop.eup %662 }
 0x1a4   : > { %579 = vmatmul.msk.f32.vlgmr.msra.gmra.mxu1 %vm334_vm2, %v663_v16  ;;  %v352_v17 = vsel %vm334_vm2, %v663_v16, 0.0  ;;  %v665_v19 = vpop.eup %664 }
 0x1a5   : > { %353 = vadd.xlane.f32.xlu1 %v352_v17  ;;  %v351_v21 = vmul.f32 %v665_v19, %v350_v20 }
 0x1be   : > { %361 = vperm.xlu1 %660, %v665_v19  }
 0x218   : > { %v354_v22 = vpop.xlane.xlu1 %353 }
 0x219   : > { %v355_v23 = vadd.f32 %v354_v22, %v351_v21 }
 0x21b   : > { %357 = vst.msk [vmem:[#allocation3] sm:$0xff] %vm297_vm1, %v355_v23 }
 0x221   : > { %v385_v36 = vpop.f32.mrf.mxu1 }
 0x222   : > { %v395_v24 = vld [vmem:[#allocation3] sm:$0xff] }
 0x223   : > { %666 = vrcp.f32 %v395_v24  ;;  %v407_v28 = vand.u32 2147483648, %v395_v24  ;;  %v405_v31 = vand.u32 2147483647, %v395_v24  ;;  %vm401_vm4 = vweird.f32 %v395_v24 }
 0x225   : > { %v408_v35 = vor.u32 1.1754944e-38, %v407_v28  ;;  %vm406_vm6 = vcmp.eq.f32.partialorder %v405_v31, 8.507059e+37 }
 0x229   : > { %v667_v25 = vpop.eup %666 }
 0x22a   : > { %v397_v26 = vmul.f32 %v667_v25, %v395_v24  ;;  %vm402_vm3 = vweird.f32 %v667_v25 }
 0x22b   : > { %vm403_vm5 = vmor %vm401_vm4, %vm402_vm3 }
 0x22c   : > { %v398_v27 = vsub.f32 1.0, %v397_v26 }
 0x22e   : > { %v399_v30 = vmul.f32 %v667_v25, %v398_v27 }
 0x230   : > { %v362_v32 = vpop.permute.xlu1 %361  ;;  %v400_v33 = vadd.f32 %v667_v25, %v399_v30 }
 0x231   : > { %v364_v34 = vmul.f32 %v362_v32, %v358_v29 }
 0x232   : > { %v404_v37 = vsel %vm403_vm5, %v667_v25, %v400_v33 }
 0x233   : > { %v388_v38 = vadd.f32 %v385_v36, %v364_v34  ;;  %v409_v39 = vsel %vm406_vm6, %v408_v35, %v404_v37 }
 0x234   : > { %412 = vperm.xlu2 %661, %v409_v39  }
 0x235   : > { %389 = vst.msk [vmem:[#allocation4] sm:$0xff] %vm300_vm0, %v388_v38 }
 0x23c   : > { %v394_v40 = vld [vmem:[#allocation4] sm:$0xff] }
 0x28e   : > { %v413_v41 = vpop.permute.xlu2 %412 }
 0x28f   : > { %v415_v42 = vmul.f32 %v413_v41, %v394_v40 }
 0x291   : > { %416 = vst.msk [vmem:[%s292_s21] sm:$0xff] %vm300_vm0, %v415_v42 }
 0x292   : > { %785 = shalt.err (!%p782_p13)
}
 0x293   : > { %590 = dma.vmem_to_hbm [thread:$0]  (%p924_p9), %s432_s23, 128, %s434_s6, %s418_s7  }
 0x294 PF: > { %s445_s22 = sand.u32 1, %s824_s12   ;;  %p603_p0 = pnand %p565_p12, %p931_p11 }
 0x295   : > { %s446_s28 = scalar_lea.sflag [#allocation7], %s445_s22 }
 0x296   : > { %p604_p1 = pneg %p603_p0 }
 0x298   : > { %819 = dma.done.wait (%p604_p1), %s446_s28, 128  }
 0x299   : > { %821 = vsyncadd (%p604_p1), %s446_s28, 4294967168  ;;  %s22_s17 = sadd.s32 1, %s844_s17   ;;  %s1056_s30 = sld [smem:[#allocation17_spill]] }
 0x29a   : > { %p19_p2 = scmp.ge.s32.totalorder %s22_s17, 4   ;;  %s1057_s15 = sld [smem:[#allocation15_spill]] }
 0x29b   : > { %s1058_s16 = sld [smem:[#allocation16_spill]]  ;;  %s1059_s12 = smov %s828_s13 }
 0x29c   : > { %s1060_s13 = smov %s832_s14  ;;  %21 = sbr.rel (!%p19_p2) target bundleno = 10 (0xa), region = 109 }
 0x29f   : > { %s1061_s14 = smov %s1056_s30 }
 0x2a1   :  { %452 = vsyncpa [#allocation6], 1 }
 0x2a2   :  { %454 = vsyncpa [#allocation6 + $0x1], 1 }
 0x2a3   :  { %455 = vsyncpa [#allocation9], 1 }
 0x2a4   :  { %457 = vsyncpa [#allocation9 + $0x1], 1 }
 0x2a5   :  { %458 = vsyncpa [#allocation7], 1 }
 0x2a6   :  { %460 = vsyncpa [#allocation7 + $0x1], 1 }

</bundles_post_ra>
